<compile_context>
chip_gen: v5e
topology: v5e:2x2
jax: 0.10.0
libtpu: 0.0.40
codegen_flags: <defaults>
</compile_context>

<pallas_src>
import functools

import jax
import jax.numpy as jnp
from jax.experimental import pallas as pl
from jax.experimental.pallas import tpu as pltpu


def _cdiv(a, b):
    return -(-a // b)


def _round_up(a, m):
    return _cdiv(a, m) * m


def _pick_vmem_budget():
    """Returns (per-block byte budget, vmem_limit_bytes) per TPU generation.

    v5e/v6e: 128 MiB physical VMEM per TensorCore -> ~12 MiB blocks.
    v7x:     64 MiB per TC -> ~8 MiB blocks, scoped limit kept <= ~48 MiB.
    Falls back to the conservative (v7x) numbers if the query fails.
    """
    phys = 64 << 20
    try:
        info = pltpu.get_tpu_info()
        phys = int(getattr(info, "vmem_capacity_bytes", phys))
    except Exception:
        pass
    if phys >= (96 << 20):            # v5e / v6e
        return 12 << 20, 56 << 20     # (block bytes, vmem_limit_bytes)
    return 8 << 20, 40 << 20          # v7x-class (64 MiB/TC)


def _h_sigmoid_kernel(x_ref, o_ref, *, h_max):
    # f32 internal math: fully hidden under the HBM stream on every generation,
    # and gives exact parity with an f32 reference for bf16/fp8 inputs.
    x = x_ref[...].astype(jnp.float32)
    y = jnp.clip(x + 3.0, 0.0, 6.0) * (h_max / 6.0)
    o_ref[...] = y.astype(o_ref.dtype)


def h_sigmoid(x, h_max: float = 1.0, *, inplace: bool = True):
    """Elementwise hard-sigmoid: relu6(x + 3) * h_max / 6. Works on any shape."""
    orig_shape = x.shape
    dtype = x.dtype
    n = x.size
    if n == 0:
        return x

    LANES = 128
    itemsize = jnp.dtype(dtype).itemsize
    # Native packed sublane multiple: 8 for 4-byte, 16 for 2-byte, 32 for 1-byte.
    sub = max(8, 32 // itemsize)

    block_bytes, vmem_limit = _pick_vmem_budget()
    tr_cap = max(sub, (block_bytes // (LANES * itemsize)) // sub * sub)

    rows = _cdiv(n, LANES)
    padded = rows * LANES

    x_flat = jnp.ravel(x)
    if padded != n:
        # TODO(synk): pad + trailing-slice fallback for non-128-aligned n costs
        # ~2 extra HBM passes; a flat pl.ANY + manual exact-length DMA variant
        # would remove it. All 128-aligned sizes below are zero-copy views.
        x_flat = jnp.pad(x_flat, (0, padded - n))
    x2d = x_flat.reshape(rows, LANES)

    # Tiling: single full-array block for small tensors (block == full dims, so
    # no (8,128) divisibility constraint); otherwise big blocks with >= 2
    # (preferably even) grid steps so v7x can stream on both TensorCores.
    # Pallas masks the ragged final block, so rows need not divide evenly.
    small = rows * LANES * itemsize <= (1 << 20)
    if small:
        g, tr = 1, rows
    else:
        tr = min(tr_cap, _round_up(_cdiv(rows, 2), sub))
        g = _cdiv(rows, tr)                       # always >= 2 here
        if g > 1 and g % 2 == 1:                  # prefer even g for 2 TCs
            tr_even = _round_up(_cdiv(rows, g + 1), sub)
            tr, g = tr_even, _cdiv(rows, tr_even)

    kernel = functools.partial(_h_sigmoid_kernel, h_max=float(h_max))

    cost = pl.CostEstimate(
        flops=3 * padded,
        transcendentals=0,
        bytes_accessed=2 * padded * itemsize,
    )

    out2d = pl.pallas_call(
        kernel,
        out_shape=jax.ShapeDtypeStruct((rows, LANES), dtype),
        grid_spec=pltpu.PrefetchScalarGridSpec(
            num_scalar_prefetch=0,
            grid=(g,),
            in_specs=[pl.BlockSpec((tr, LANES), lambda i: (i, 0))],
            out_specs=pl.BlockSpec((tr, LANES), lambda i: (i, 0)),
        ),
        compiler_params=pltpu.CompilerParams(
            # "parallel" lets v7x shard the streaming grid across its 2 TCs;
            # measured as a no-op (not a regression) on single-TC v5e/v6e.
            dimension_semantics=("parallel",),
            vmem_limit_bytes=vmem_limit,
        ),
        cost_estimate=cost,
        input_output_aliases=({0: 0} if inplace else {}),
    )(x2d)

    out_flat = out2d.reshape(-1)
    if padded != n:
        out_flat = out_flat[:n]
    return out_flat.reshape(orig_shape)


def h_sigmoid_ref(x, h_max: float = 1.0):
    return jnp.clip(x + 3.0, 0.0, 6.0) * h_max / 6.0


if __name__ == "__main__":
    key = jax.random.PRNGKey(0)
    k1, k2, k3 = jax.random.split(key, 3)

    # 1) Small NCHW f32 input -> single-block fast path (zero-copy).
    x = jax.random.normal(k1, (2, 4, 16, 16), dtype=jnp.float32) * 4.0
    ref = h_sigmoid_ref(x, h_max=1.0)
    out = jax.block_until_ready(h_sigmoid(x, h_max=1.0))
    assert out.shape == x.shape and out.dtype == x.dtype
    assert jnp.allclose(out, ref, atol=1e-6), "f32 mismatch vs reference"

    # 2) bf16 input (f32-internal math -> matches the f32 reference closely).
    xb = x.astype(jnp.bfloat16)
    refb = h_sigmoid_ref(xb.astype(jnp.float32), h_max=1.0)
    outb = jax.block_until_ready(h_sigmoid(xb, h_max=1.0))
    assert outb.shape == xb.shape and outb.dtype == xb.dtype
    assert jnp.allclose(outb.astype(jnp.float32), refb, atol=1e-2), "bf16 mismatch"

    # 3) 128-aligned medium tensor -> multi-block (g>=2) zero-copy path with a
    #    ragged (masked) final block.
    xm = jax.random.normal(k2, (2, 4, 375, 128), dtype=jnp.float32) * 4.0
    refm = h_sigmoid_ref(xm, h_max=2.0)
    outm = jax.block_until_ready(h_sigmoid(xm, h_max=2.0))
    assert outm.shape == xm.shape and outm.dtype == xm.dtype
    assert jnp.allclose(outm, refm, atol=1e-6), "multi-block mismatch"

    # 4) Awkward size (not a multiple of 128) -> pad/slice fallback path.
    xa = jax.random.normal(k3, (3, 5, 7, 11), dtype=jnp.float32) * 4.0
    refa = h_sigmoid_ref(xa, h_max=2.0)
    outa = jax.block_until_ready(h_sigmoid(xa, h_max=2.0))
    assert outa.shape == xa.shape and outa.dtype == xa.dtype
    assert jnp.allclose(outa, refa, atol=1e-6), "awkward-shape mismatch"

    print("KERNEL_OK")
</pallas_src>

<mosaic_0001>
module attributes {stable_mosaic.version = 11 : i64} {
  func.func @_h_sigmoid_kernel(%arg0: i32, %arg1: memref<16x128xf32, #tpu.memory_space<vmem>>, %arg2: memref<16x128xf32, #tpu.memory_space<vmem>>) attributes {dimension_semantics = [#tpu.dimension_semantics<parallel>], iteration_bounds = array<i64: 1>, scalar_prefetch = 0 : i64, scratch_operands = 0 : i64, tpu.core_type = #tpu.core_type<tc>, window_params = [{transform_indices = @transform_0, window_bounds = array<i64: 16, 128>}, {transform_indices = @transform_1, window_bounds = array<i64: 16, 128>}]} {
    %c0 = arith.constant 0 : index
    %c0_0 = arith.constant 0 : index
    %0 = vector.load %arg1[%c0, %c0_0] : memref<16x128xf32, #tpu.memory_space<vmem>>, vector<16x128xf32>
    %cst = arith.constant 3.000000e+00 : f32
    %1 = vector.broadcast %cst : f32 to vector<16x128xf32>
    %2 = arith.addf %0, %1 : vector<16x128xf32>
    %cst_1 = arith.constant 0.000000e+00 : f32
    %cst_2 = arith.constant 6.000000e+00 : f32
    %3 = vector.broadcast %cst_1 : f32 to vector<16x128xf32>
    %4 = arith.maximumf %3, %2 : vector<16x128xf32>
    %5 = vector.broadcast %cst_2 : f32 to vector<16x128xf32>
    %6 = arith.minimumf %5, %4 : vector<16x128xf32>
    %cst_3 = arith.constant 0.166666672 : f32
    %7 = vector.broadcast %cst_3 : f32 to vector<16x128xf32>
    %8 = arith.mulf %6, %7 : vector<16x128xf32>
    %c0_4 = arith.constant 0 : index
    %c0_5 = arith.constant 0 : index
    %9 = vector.load %arg2[%c0_4, %c0_5] : memref<16x128xf32, #tpu.memory_space<vmem>>, vector<16x128xf32>
    tpu.vector_store %arg2[%c0_4, %c0_5], %8 {strides = array<i32>} : memref<16x128xf32, #tpu.memory_space<vmem>>, vector<16x128xf32>,
    return
  }
  func.func @transform_0(%arg0: i32) -> (i32, i32) {
    %c0_i32 = arith.constant 0 : i32
    %c0_i32_0 = arith.constant 0 : i32
    return %arg0, %c0_i32 : i32, i32
  }
  func.func @transform_1(%arg0: i32) -> (i32, i32) {
    %c0_i32 = arith.constant 0 : i32
    %c0_i32_0 = arith.constant 0 : i32
    return %arg0, %c0_i32 : i32, i32
  }
}

</mosaic_0001>

<bundles_post_ra>
// kernel: tpu_custom_call.1
= control target key start
LH: loop header
LB: loop body
LE: loop exit
PB: predicated region body
PF: predicated region fallthrough
CT: control target
= control target key end

     0   :  { %6 = vsyncpa [#allocation3], 0  ;;  %s132_s0 = inlined_call_operand.hbm [shape: f32[16,128], index: 0, kind: input, shape index: {}, may-alias: {0,1}]   ;;  %s133_s1 = inlined_call_operand.hbm [shape: f32[16,128], index: 1, kind: output, shape index: {}, may-alias: {0,1}]  }
   0x1   :  { %7 = vsyncpa [#allocation4], 0  ;;  %s12_s8 = sshll.u32 %s132_s0, 4  ;;  %s112_s9 = smov [#allocation2]   ;;  %s13_s8 = int_to_ptr.hbm [resolvable:$true] %s12_s8 }
   0x2   :  { %s14_s10 = sshll.u32 %s112_s9, 4  ;;  %s113_s11 = smov 128   ;;  %s15_s10 = int_to_ptr.vmem [resolvable:$true] %s14_s10 }
   0x3   :  { %s114_s12 = smov 8  }
   0x4   :  { %20 = dma.hbm_to_vmem [thread:$0]  %s13_s8, 256, %s15_s10, [#allocation3], %s113_s11, %s113_s11, %s114_s12  }
   0x5   :  { %108 = dma.done.wait [#allocation3], 256  }
   0x6   :  { %109 = vsyncadd [#allocation3], 4294967040  ;;  %v25_v0 = vld [vmem:[#allocation2] sm:$0xff]  ;;  %v26_v1 = vld [vmem:[#allocation2 + $0x8] sm:$0xff]  ;;  %s115_s13 = smov [#allocation5]   ;;  %s43_s16 = sshll.u32 %s133_s1, 4  ;;  %s44_s16 = int_to_ptr.hbm [resolvable:$true] %s43_s16 }
   0x7   :  { %v27_v2 = vadd.f32 3.0, %v25_v0  ;;  %v28_v3 = vadd.f32 3.0, %v26_v1  ;;  %s41_s14 = sshll.u32 %s115_s13, 4  ;;  %s42_s14 = int_to_ptr.vmem [resolvable:$true] %s41_s14 }
   0x9   :  { %v29_v4 = vmax.f32 %v27_v2, 0.0  ;;  %v30_v5 = vmax.f32 %v28_v3, 0.0 }
   0xb   :  { %v31_v6 = vmin.f32 %v29_v4, 6.0  ;;  %v32_v7 = vmin.f32 %v30_v5, 6.0 }
   0xd   :  { %v33_v8 = vmul.f32 0.16666667, %v31_v6  ;;  %v34_v9 = vmul.f32 0.16666667, %v32_v7 }
   0xf   :  { %35 = vst [vmem:[#allocation5] sm:$0xff] %v33_v8 }
  0x10   :  { %36 = vst [vmem:[#allocation5 + $0x8] sm:$0xff] %v34_v9 }
  0x11   :  { %49 = dma.vmem_to_hbm [thread:$0]  %s42_s14, 256, %s44_s16, [#allocation4], %s113_s11, %s113_s11, %s114_s12  }
  0x12   :  { %110 = dma.done.wait [#allocation4], 256  }
  0x13   :  { %111 = vsyncadd [#allocation4], 4294967040 }
  0x14   :  { %54 = vsyncpa [#allocation3], 1 }
  0x15   :  { %55 = vsyncpa [#allocation4], 1 }

</bundles_post_ra>
